<compile_context>
chip_gen: v6e
topology: v6e:2x2x1
jax: 0.10.0
libtpu: 0.0.40
codegen_flags: <defaults>
</compile_context>

<pallas_src>
import jax
import jax.numpy as jnp
from jax import lax
from jax.experimental import pallas as pl
from jax.experimental.pallas import tpu as pltpu


def _round_up(x, m):
    return (x + m - 1) // m * m


def _fused_conv_unshuffle_kernel(xm_ref, xh_ref, w_ref, o_ref):
    """One (batch, row-tile) step of conv3x3(pad=1) + PixelUnshuffle(2).

    xm_ref : (1, Mt, K)    bf16  main tile, Mt = Ht*Wcp flattened (row, col)
    xh_ref : (1, 2*Wcp, K) bf16  2-phase-row halo below the tile
    w_ref  : (2, K, 2*Np)  bf16  row-shift-0 / row-shift-1 weights packed
                                 along N; index 0/1 = column shift 0/1
    o_ref  : (1, Mt, Np)         fused conv + unshuffle output tile
    """
    mt = xm_ref.shape[1]
    k = xm_ref.shape[2]
    wcp = xh_ref.shape[1] // 2
    np_ = o_ref.shape[-1]
    ma = mt + wcp

    # Tile plus halo, flattened row-major over (phase_row, phase_col).
    x_all = jnp.concatenate([xm_ref[0], xh_ref[0]], axis=0)    # (Mt+2*Wcp, K)

    # Column shift (db=1) = +1 offset in the flattened layout; row shift
    # (da=1) is handled post-matmul via the packed N halves, so each tile is
    # just two K=192, N=256 MXU matmuls.
    r = jnp.dot(x_all[0:ma], w_ref[0], preferred_element_type=jnp.float32)
    r = r + jnp.dot(x_all[1:ma + 1], w_ref[1],
                    preferred_element_type=jnp.float32)

    out = r[0:mt, 0:np_] + r[wcp:ma, np_:2 * np_]               # row-shifted add
    o_ref[0] = out.astype(o_ref.dtype)


def _pick_row_tile(h2, wcp, k, npad, batch, budget_bytes=16 << 20):
    """Even row-tile height from a per-position VMEM footprint model:
       2x double-buffered bf16 input, 2x double-buffered output,
       concat + shifted bf16 operand copies, f32 matmul results, combine temp.
    """
    per_pos = (2 * 2 * k            # double-buffered bf16 input block
               + 2 * 2 * k          # concat copy + shifted-operand copy (bf16)
               + 2 * 4 * npad       # double-buffered output block (f32)
               + 2 * 4 * 2 * npad   # f32 matmul results (MA, 2*Np)
               + 4 * npad)          # f32 combine temp
    ht = budget_bytes // max(per_pos * wcp, 1)
    ht = min(ht, h2)
    if batch == 1 and h2 >= 4:
        ht = min(ht, -(-h2 // 2))   # keep >=2 row tiles for v7x megacore
    ht = max(2, (ht // 2) * 2)      # even: halo block index = (t+1)*Ht/2
    return int(ht)


def _build_packed_weights(w_oihw, npad):
    """(Cout, Cin, 3, 3) OIHW -> (2, 4*Cin, 2*npad) polyphase weights.

    First index = column shift db.  Along the last axis the two row-shift
    weights are concatenated: [:npad] = da=0, [npad:] = da=1.
    K order = (p, q, cin)     (matches the wrapper's space-to-depth layout)
    N order = (cout, r1, r2)  (= PixelUnshuffle channel order), zero-padded
                              from 4*Cout up to npad for lane-dense stores.
    """
    cout, cin = w_oihw.shape[0], w_oihw.shape[1]
    w_hwio = jnp.transpose(w_oihw, (2, 3, 1, 0))        # (ky, kx, cin, cout)
    wfull = jnp.zeros((2, 2, 2, 2, cin, cout, 2, 2), w_oihw.dtype)
    for da in range(2):
        for db in range(2):
            for p in range(2):
                for q in range(2):
                    for r1 in range(2):
                        for r2 in range(2):
                            ky = 2 * da + p - r1
                            kx = 2 * db + q - r2
                            if 0 <= ky <= 2 and 0 <= kx <= 2:
                                wfull = wfull.at[da, db, p, q, :, :, r1, r2].set(
                                    w_hwio[ky, kx])
    wk = wfull.reshape(2, 2, 4 * cin, 4 * cout)
    wk = jnp.pad(wk, ((0, 0), (0, 0), (0, 0), (0, npad - 4 * cout)))
    return jnp.concatenate([wk[0], wk[1]], axis=-1)     # (2[db], K, 2*npad)


def _conv_unshuffle_pallas(xcol, wp, b, n_tiles, ht, wcp, npad, out_dtype):
    k = xcol.shape[-1]
    mt = ht * wcp
    flops = 2 * b * n_tiles * 2 * (mt + wcp) * k * (2 * npad)
    bytes_accessed = (xcol.size * 2 + wp.size * 2
                      + b * n_tiles * mt * npad * jnp.dtype(out_dtype).itemsize)
    return pl.pallas_call(
        _fused_conv_unshuffle_kernel,
        out_shape=jax.ShapeDtypeStruct((b, n_tiles * mt, npad), out_dtype),
        grid=(b, n_tiles),
        in_specs=[
            # main row-tile, already flattened over (phase_row, phase_col)
            pl.BlockSpec((1, mt, k), lambda bi, ti: (bi, ti, 0)),
            # 2-phase-row halo directly below the tile (same array)
            pl.BlockSpec((1, 2 * wcp, k),
                         lambda bi, ti: (bi, (ti + 1) * (ht // 2), 0)),
            # packed weights, resident across the whole grid
            pl.BlockSpec((2, k, 2 * npad), lambda bi, ti: (0, 0, 0)),
        ],
        out_specs=pl.BlockSpec((1, mt, npad), lambda bi, ti: (bi, ti, 0)),
        compiler_params=pltpu.CompilerParams(
            dimension_semantics=("parallel", "parallel"),
            vmem_limit_bytes=48 << 20),
        cost_estimate=pl.CostEstimate(
            flops=flops, transcendentals=0, bytes_accessed=bytes_accessed),
    )(xcol, xcol, wp)


def downsample_forward(x_nchw, w_oihw):
    """Downsample.forward: conv3x3 (pad=1, no bias) + PixelUnshuffle(2). NCHW."""
    B, Cin, H, W = x_nchw.shape
    Cout = w_oihw.shape[0]
    assert H % 2 == 0 and W % 2 == 0, "PixelUnshuffle(2) needs even H, W"
    H2, W2 = H // 2, W // 2
    K = 4 * Cin
    Npad = _round_up(4 * Cout, 128)        # lane-dense stores (96 -> 128)
    Wcp = _round_up(W2 + 1, 8)             # phase cols incl. right halo, aligned

    Ht = _pick_row_tile(H2, Wcp, K, Npad, B)
    n_tiles = -(-H2 // Ht)
    H2p = n_tiles * Ht

    # ---- input prep: one pad + one transpose into the space-to-depth layout
    # (b, phase_row, phase_col, (p, q, cin)), zero-extended to H2p+2 phase
    # rows / Wcp phase cols, flattened over (row, col) for the kernel.
    pad_bottom = 2 * (H2p + 2) - H - 1
    pad_right = 2 * Wcp - W - 1
    xp = jnp.pad(x_nchw, ((0, 0), (0, 0), (1, pad_bottom), (1, pad_right)))
    x4 = xp.reshape(B, Cin, H2p + 2, 2, Wcp, 2)
    x4 = jnp.transpose(x4, (0, 2, 4, 3, 5, 1))          # (b, a, c, p, q, cin)
    xcol = x4.reshape(B, (H2p + 2) * Wcp, K).astype(jnp.bfloat16)
    # TODO(synk): if the surrounding model runs NHWC, the NCHW<->NHWC plumbing
    # here and on the output could be dropped entirely.

    wp = _build_packed_weights(w_oihw, Npad).astype(jnp.bfloat16)

    out_k = _conv_unshuffle_pallas(xcol, wp, B, n_tiles, Ht, Wcp, Npad,
                                   x_nchw.dtype)

    # ---- strip padding + single NHWC->NCHW transpose (PixelUnshuffle channel
    # order (cout, r1, r2) is already baked into the kernel's N axis).
    out = out_k.reshape(B, H2p, Wcp, Npad)[:, :H2, :W2, :4 * Cout]
    return jnp.transpose(out, (0, 3, 1, 2))             # (B, 4*Cout, H2, W2)


def _pixel_unshuffle_nchw(y, r=2):
    B, C, H, W = y.shape
    y = y.reshape(B, C, H // r, r, W // r, r)
    y = jnp.transpose(y, (0, 1, 3, 5, 2, 4))
    return y.reshape(B, C * r * r, H // r, W // r)


if __name__ == "__main__":
    n_feat = 48            # module default
    B, H, W = 2, 16, 16
    Cout = n_feat // 2

    key = jax.random.PRNGKey(0)
    kx_, kw_ = jax.random.split(key)
    x = jax.random.normal(kx_, (B, n_feat, H, W), dtype=jnp.float32)
    w = jax.random.normal(kw_, (Cout, n_feat, 3, 3), dtype=jnp.float32) * 0.05

    fwd = jax.jit(downsample_forward)
    out = jax.block_until_ready(fwd(x, w))
    assert out.shape == (B, 2 * n_feat, H // 2, W // 2), out.shape

    # Reference with matched bf16 input quantization (kernel is bf16 x bf16 -> f32).
    xq = x.astype(jnp.bfloat16).astype(jnp.float32)
    wq = w.astype(jnp.bfloat16).astype(jnp.float32)
    ref_conv = lax.conv_general_dilated(
        xq, wq, window_strides=(1, 1), padding=((1, 1), (1, 1)),
        dimension_numbers=("NCHW", "OIHW", "NCHW"))
    ref = _pixel_unshuffle_nchw(ref_conv, r=2)
    err = float(jnp.max(jnp.abs(out - ref)))
    assert err < 1e-3, f"max abs error {err}"

    print("KERNEL_OK")
</pallas_src>

<mosaic_0001>
module attributes {stable_mosaic.version = 11 : i64} {
  func.func @_fused_conv_unshuffle_kernel(%arg0: i32, %arg1: i32, %arg2: memref<1x128x192xbf16, #tpu.memory_space<vmem>>, %arg3: memref<1x32x192xbf16, #tpu.memory_space<vmem>>, %arg4: memref<2x192x256xbf16, #tpu.memory_space<vmem>>, %arg5: memref<1x128x128xf32, #tpu.memory_space<vmem>>) attributes {dimension_semantics = [#tpu.dimension_semantics<parallel>, #tpu.dimension_semantics<parallel>], iteration_bounds = array<i64: 2, 1>, scalar_prefetch = 0 : i64, scratch_operands = 0 : i64, tpu.core_type = #tpu.core_type<tc>, window_params = [{transform_indices = @transform_0, window_bounds = array<i64: 1, 128, 192>}, {transform_indices = @transform_1, window_bounds = array<i64: 1, 32, 192>}, {pipeline_mode = #tpu.pipeline_mode<synchronous>, transform_indices = @transform_2, window_bounds = array<i64: 2, 192, 256>}, {transform_indices = @transform_3, window_bounds = array<i64: 1, 128, 128>}]} {
    %c0 = arith.constant 0 : index
    %c0_0 = arith.constant 0 : index
    %c0_1 = arith.constant 0 : index
    %0 = vector.load %arg2[%c0, %c0_0, %c0_1] : memref<1x128x192xbf16, #tpu.memory_space<vmem>>, vector<1x128x192xbf16>
    %1 = vector.shape_cast %0 : vector<1x128x192xbf16> to vector<128x192xbf16>
    %c0_2 = arith.constant 0 : index
    %c0_3 = arith.constant 0 : index
    %c0_4 = arith.constant 0 : index
    %2 = vector.load %arg3[%c0_2, %c0_3, %c0_4] : memref<1x32x192xbf16, #tpu.memory_space<vmem>>, vector<1x32x192xbf16>
    %3 = vector.shape_cast %2 : vector<1x32x192xbf16> to vector<32x192xbf16>
    %4 = tpu.concatenate %1, %3 in 0 : vector<128x192xbf16>, vector<32x192xbf16> -> vector<160x192xbf16>
    %5 = vector.extract_strided_slice %4 {offsets = [0, 0], sizes = [144, 192], strides = [1, 1]} : vector<160x192xbf16> to vector<144x192xbf16>
    %c0_5 = arith.constant 0 : index
    %c0_6 = arith.constant 0 : index
    %c0_7 = arith.constant 0 : index
    %6 = vector.load %arg4[%c0_5, %c0_6, %c0_7] : memref<2x192x256xbf16, #tpu.memory_space<vmem>>, vector<1x192x256xbf16>
    %7 = vector.shape_cast %6 : vector<1x192x256xbf16> to vector<192x256xbf16>
    %cst = arith.constant dense<0.000000e+00> : vector<144x256xf32>
    %8 = tpu.matmul %5, %7, %cst {dimension_numbers = #tpu.dot_dimension_numbers<[1], [0], [0], [1], [0, 0, 1, 1], [], []>} : vector<144x192xbf16>, vector<192x256xbf16>, vector<144x256xf32> -> vector<144x256xf32>
    %9 = vector.extract_strided_slice %4 {offsets = [1, 0], sizes = [144, 192], strides = [1, 1]} : vector<160x192xbf16> to vector<144x192xbf16>
    %c1 = arith.constant 1 : index
    %c0_8 = arith.constant 0 : index
    %c0_9 = arith.constant 0 : index
    %10 = vector.load %arg4[%c1, %c0_8, %c0_9] : memref<2x192x256xbf16, #tpu.memory_space<vmem>>, vector<1x192x256xbf16>
    %11 = vector.shape_cast %10 : vector<1x192x256xbf16> to vector<192x256xbf16>
    %cst_10 = arith.constant dense<0.000000e+00> : vector<144x256xf32>
    %12 = tpu.matmul %9, %11, %cst_10 {dimension_numbers = #tpu.dot_dimension_numbers<[1], [0], [0], [1], [0, 0, 1, 1], [], []>} : vector<144x192xbf16>, vector<192x256xbf16>, vector<144x256xf32> -> vector<144x256xf32>
    %13 = arith.addf %8, %12 : vector<144x256xf32>
    %14 = vector.extract_strided_slice %13 {offsets = [0, 0], sizes = [128, 128], strides = [1, 1]} : vector<144x256xf32> to vector<128x128xf32>
    %15 = vector.extract_strided_slice %13 {offsets = [16, 128], sizes = [128, 128], strides = [1, 1]} : vector<144x256xf32> to vector<128x128xf32>
    %16 = arith.addf %14, %15 : vector<128x128xf32>
    %c0_11 = arith.constant 0 : index
    %c0_12 = arith.constant 0 : index
    %c0_13 = arith.constant 0 : index
    %17 = vector.load %arg5[%c0_11, %c0_12, %c0_13] : memref<1x128x128xf32, #tpu.memory_space<vmem>>, vector<1x128x128xf32>
    %18 = vector.shape_cast %17 : vector<1x128x128xf32> to vector<128x128xf32>
    %19 = vector.shape_cast %16 : vector<128x128xf32> to vector<1x128x128xf32>
    tpu.vector_store %arg5[%c0_11, %c0_12, %c0_13], %19 {strides = array<i32>} : memref<1x128x128xf32, #tpu.memory_space<vmem>>, vector<1x128x128xf32>,
    return
  }
  func.func @transform_0(%arg0: i32, %arg1: i32) -> (i32, i32, i32) {
    %c0_i32 = arith.constant 0 : i32
    %c0_i32_0 = arith.constant 0 : i32
    return %arg0, %arg1, %c0_i32 : i32, i32, i32
  }
  func.func @transform_1(%arg0: i32, %arg1: i32) -> (i32, i32, i32) {
    %c1_i32 = arith.constant 1 : i32
    %0 = arith.addi %arg1, %c1_i32 : i32
    %c4_i32 = arith.constant 4 : i32
    %1 = arith.muli %0, %c4_i32 : i32
    %c0_i32 = arith.constant 0 : i32
    %c0_i32_0 = arith.constant 0 : i32
    return %arg0, %1, %c0_i32 : i32, i32, i32
  }
  func.func @transform_2(%arg0: i32, %arg1: i32) -> (i32, i32, i32) {
    %c0_i32 = arith.constant 0 : i32
    %c0_i32_0 = arith.constant 0 : i32
    %c0_i32_1 = arith.constant 0 : i32
    %c0_i32_2 = arith.constant 0 : i32
    return %c0_i32, %c0_i32_0, %c0_i32_1 : i32, i32, i32
  }
  func.func @transform_3(%arg0: i32, %arg1: i32) -> (i32, i32, i32) {
    %c0_i32 = arith.constant 0 : i32
    %c0_i32_0 = arith.constant 0 : i32
    return %arg0, %arg1, %c0_i32 : i32, i32, i32
  }
}

</mosaic_0001>

<bundles_post_ra>
// kernel: downsample_forward.1
= control target key start
LH: loop header
LB: loop body
LE: loop exit
PB: predicated region body
PF: predicated region fallthrough
CT: control target
= control target key end

     0   :  { %s1576_s12 = smov 0   ;;  %s1578_s13 = smov 0   ;;  %s1842_s0 = inlined_call_operand.vmem [shape: bf16[2,160,192], index: 0, kind: input, shape index: {}, may-alias: {0,1}]   ;;  %s1843_s1 = inlined_call_operand.vmem [shape: bf16[2,160,192], index: 1, kind: input, shape index: {}, may-alias: {0,1}]   ;;  %s1844_s2 = inlined_call_operand.vmem [shape: bf16[2,192,256], index: 2, kind: input, shape index: {}]   ;;  %s1845_s3 = inlined_call_operand.vmem [shape: f32[2,128,128], index: 3, kind: output, shape index: {}]  }
   0x1   :  { %s1580_s14 = smov 0  }
   0x2 LB: > { %s25_s15 = sadd.s32 1, %s1550_s13  ;;  %p1283_p0 = scmp.ge.s32.totalorder %s1554_s14, 1  ;;  %s1554_s14 = sphi %s1580_s14, %s13_s14   ;;  %s1550_s13 = sphi %s1578_s13, %s1847_s13   ;;  %s1546_s12 = sphi %s1576_s12, %s1846_s12  }
   0x3   : > { %p27_p1 = scmp.ge.s32.totalorder %s25_s15, 2  ;;  %p195_p2 = scmp.lt.s32.totalorder %s1554_s14, 3 }
   0x5   : > { %s1849_s15 = smov (%p27_p1, %s25_s15), 0  ;;  %p196_p3 = pnand %p1283_p0, %p195_p2 }
   0x6   : > { %p251_p4 = scmp.lt.s32.totalorder (!%p196_p3), %s1546_s12, 1 }
   0x7   : > { %199 = sbr.rel (%p196_p3) target bundleno = 330 (0x14a), region = 32 }
   0xc   : > { %v1430_v0 = vld [vmem:[%s1844_s2 + $0x134] ss:$8 sps:$4 sm:$0xff]   ;;  %v1434_v2 = vld [vmem:[%s1844_s2 + $0x130] ss:$8 sps:$4 sm:$0xff]   ;;  %v1436_v4 = vld [vmem:[%s1844_s2 + $0x124] ss:$8 sps:$4 sm:$0xff]  }
   0xd   : > { %v1432_v1 = vld [vmem:[%s1844_s2 + $0x74] ss:$8 sps:$4 sm:$0xff]   ;;  %760 = vmatprep.subr.bf16.mxu0 %v1430_v0  ;;  %v1435_v3 = vld [vmem:[%s1844_s2 + $0x70] ss:$8 sps:$4 sm:$0xff]   ;;  %s1851_s12 = smov (!%p251_p4, %s1546_s12), 1  ;;  %vm732_vm0 = vcmask 523264  }
   0xe   : > { %1017 = vmatprep.subr.bf16.mxu1 %v1432_v1  ;;  %761 = vmatpush1.bf16.msra.mxu0 %v1434_v2  ;;  %v1438_v5 = vld [vmem:[%s1844_s2 + $0x64] ss:$8 sps:$4 sm:$0xff]   ;;  %v1440_v6 = vld [vmem:[%s1844_s2 + $0x120] ss:$8 sps:$4 sm:$0xff]   ;;  %v1442_v8 = vld [vmem:[%s1844_s2 + $0x114] ss:$8 sps:$4 sm:$0xff]  }
   0xf   : > { %1018 = vmatpush1.bf16.msra.mxu1 %v1435_v3  ;;  %762 = vmatprep.subr.bf16.mxu0 %v1436_v4  ;;  %v1441_v7 = vld [vmem:[%s1844_s2 + $0x60] ss:$8 sps:$4 sm:$0xff]   ;;  %v1444_v9 = vld [vmem:[%s1844_s2 + $0x54] ss:$8 sps:$4 sm:$0xff]   ;;  %v1446_v10 = vld [vmem:[%s1844_s2 + $0x110] ss:$8 sps:$4 sm:$0xff]  }
  0x10   : > { %1019 = vmatprep.subr.bf16.mxu1 %v1438_v5  ;;  %v1447_v11 = vld [vmem:[%s1844_s2 + $0x50] ss:$8 sps:$4 sm:$0xff]   ;;  %v1448_v12 = vld [vmem:[%s1844_s2 + $0x104] ss:$8 sps:$4 sm:$0xff]   ;;  %v1452_v14 = vld [vmem:[%s1844_s2 + $0x100] ss:$8 sps:$4 sm:$0xff]  }
  0x11   : > { %v1450_v13 = vld [vmem:[%s1844_s2 + $0x44] ss:$8 sps:$4 sm:$0xff]   ;;  %v1453_v15 = vld [vmem:[%s1844_s2 + $0x40] ss:$8 sps:$4 sm:$0xff]   ;;  %v1454_v16 = vld [vmem:[%s1844_s2 + $0xf4] ss:$8 sps:$4 sm:$0xff]  }
  0x12   : > { %763 = vmatpush1.bf16.msra.mxu0 %v1440_v6  ;;  %v1456_v17 = vld [vmem:[%s1844_s2 + $0x34] ss:$8 sps:$4 sm:$0xff]   ;;  %v1458_v18 = vld [vmem:[%s1844_s2 + $0xf0] ss:$8 sps:$4 sm:$0xff]   ;;  %v1460_v20 = vld [vmem:[%s1844_s2 + $0xe4] ss:$8 sps:$4 sm:$0xff]  }
  0x13   : > { %1020 = vmatpush1.bf16.msra.mxu1 %v1441_v7  ;;  %764 = vmatprep.subr.bf16.mxu0 %v1442_v8  ;;  %v1459_v19 = vld [vmem:[%s1844_s2 + $0x30] ss:$8 sps:$4 sm:$0xff]   ;;  %v1462_v21 = vld [vmem:[%s1844_s2 + $0x24] ss:$8 sps:$4 sm:$0xff]   ;;  %v1464_v22 = vld [vmem:[%s1844_s2 + $0xe0] ss:$8 sps:$4 sm:$0xff]  }
  0x14   : > { %1021 = vmatprep.subr.bf16.mxu1 %v1444_v9  ;;  %v1465_v23 = vld [vmem:[%s1844_s2 + $0x20] ss:$8 sps:$4 sm:$0xff]   ;;  %v1466_v24 = vld [vmem:[%s1844_s2 + $0xd4] ss:$8 sps:$4 sm:$0xff]   ;;  %v1470_v26 = vld [vmem:[%s1844_s2 + $0xd0] ss:$8 sps:$4 sm:$0xff]  }
  0x15   : > { %v1468_v25 = vld [vmem:[%s1844_s2 + $0x14] ss:$8 sps:$4 sm:$0xff]   ;;  %v1471_v27 = vld [vmem:[%s1844_s2 + $0x10] ss:$8 sps:$4 sm:$0xff]   ;;  %v1472_v28 = vld [vmem:[%s1844_s2 + $0xc4] ss:$8 sps:$4 sm:$0xff]  }
  0x16   : > { %765 = vmatpush1.bf16.msra.mxu0 %v1446_v10  ;;  %v1474_v29 = vld [vmem:[%s1844_s2 + $0x4] ss:$8 sps:$4 sm:$0xff]   ;;  %s1403_s30 = smul.u32 160, %s1851_s12  ;;  %v1476_v30 = vld [vmem:[%s1844_s2 + $0xc0] ss:$8 sps:$4 sm:$0xff]  }
  0x17   : > { %1022 = vmatpush1.bf16.msra.mxu1 %v1447_v11  ;;  %766 = vmatprep.subr.bf16.mxu0 %v1448_v12  ;;  %v1477_v31 = vld [vmem:[%s1844_s2] ss:$8 sps:$4 sm:$0xff]   ;;  %v1478_v32 = vld [vmem:[%s1844_s2 + $0x174] ss:$8 sps:$4 sm:$0xff]   ;;  %v1482_v34 = vld [vmem:[%s1844_s2 + $0x170] ss:$8 sps:$4 sm:$0xff]  }
  0x18   : > { %1023 = vmatprep.subr.bf16.mxu1 %v1450_v13  ;;  %v1480_v33 = vld [vmem:[%s1844_s2 + $0xb4] ss:$8 sps:$4 sm:$0xff]   ;;  %s1707_s20 = scalar_lea.vmem %s1842_s0, %s1403_s30  ;;  %v1483_v35 = vld [vmem:[%s1844_s2 + $0xb0] ss:$8 sps:$4 sm:$0xff]   ;;  %v1484_v36 = vld [vmem:[%s1844_s2 + $0x164] ss:$8 sps:$4 sm:$0xff]  }
  0x19   : > { %v1486_v37 = vld [vmem:[%s1844_s2 + $0xa4] ss:$8 sps:$4 sm:$0xff]   ;;  %v1504_v39 = vld [vmem:[%s1707_s20 + $0x14] ss:$8 sps:$4 sm:$0xff]   ;;  %v1488_v40 = vld [vmem:[%s1844_s2 + $0x160] ss:$8 sps:$4 sm:$0xff]  }
  0x1a   : > { %767 = vmatpush1.bf16.msra.mxu0 %v1452_v14  ;;  %v1502_v38 = vld [vmem:[%s1707_s20 + $0x4] ss:$8 sps:$4 sm:$0xff]   ;;  %v1489_v41 = vld [vmem:[%s1844_s2 + $0xa0] ss:$8 sps:$4 sm:$0xff]   ;;  %v1490_v43 = vld [vmem:[%s1844_s2 + $0x154] ss:$8 sps:$4 sm:$0xff]  }
  0x1b   : > { %1024 = vmatpush1.bf16.msra.mxu1 %v1453_v15  ;;  %768 = vmatprep.subr.bf16.mxu0 %v1454_v16  ;;  %v1506_v42 = vld [vmem:[%s1707_s20] ss:$8 sps:$4 sm:$0xff]   ;;  %v464_v44 = vshrl.u32 %v1502_v38, 16  ;;  %v466_v45 = vshll.u32 %v1502_v38, 16  ;;  %v471_v46 = vshll.u32 %v1504_v39, 16  ;;  %v483_v62 = vshrl.u32 %v1504_v39, 16 }
  0x1c   : > { %1025 = vmatprep.subr.bf16.mxu1 %v1456_v17  ;;  %1389 = vmatprep.mubr.msk.bf16.mxu1 %vm732_vm0, %v1502_v38  ;;  %v1492_v47 = vld [vmem:[%s1844_s2 + $0x94] ss:$8 sps:$4 sm:$0xff]   ;;  %v1507_v48 = vld [vmem:[%s1707_s20 + $0x10] ss:$8 sps:$4 sm:$0xff]   ;;  %v454_v49 = vshll.u32 %v1506_v42, 16  ;;  %v452_v57 = vshrl.u32 %v1506_v42, 16 }
  0x1d   : > { %v468_v50 = vrot.slane %v466_v45, 1  ;;  %v473_v51 = vrot.slane %v471_v46, 1  ;;  %v1508_v52 = vld [vmem:[%s1707_s20 + $0x24] ss:$8 sps:$4 sm:$0xff]   ;;  %v1494_v53 = vld [vmem:[%s1844_s2 + $0x150] ss:$8 sps:$4 sm:$0xff]  }
  0x1e   : > { %769 = vmatpush1.bf16.msra.mxu0 %v1458_v18  ;;  %vm450_vm1 = vsmask.f32 7424  ;;  %v1495_v54 = vld [vmem:[%s1844_s2 + $0x90] ss:$8 sps:$4 sm:$0xff]   ;;  %v1496_v56 = vld [vmem:[%s1844_s2 + $0x144] ss:$8 sps:$4 sm:$0xff]  }
  0x1f   : > { %1026 = vmatpush1.bf16.msra.mxu1 %v1459_v19  ;;  %770 = vmatprep.subr.bf16.mxu0 %v1460_v20  ;;  %v469_v55 = vor.u32 %v468_v50, %v464_v44  ;;  %v456_v58 = vrot.slane %v454_v49, 1  ;;  %v459_v59 = vshll.u32 %v1507_v48, 16  ;;  %v1498_v60 = vld [vmem:[%s1844_s2 + $0x84] ss:$8 sps:$4 sm:$0xff]   ;;  %v487_v63 = vshll.u32 %v1508_v52, 16  ;;  %s1401_s22 = sadd.s32 128, %s1403_s30 }
  0x20   : > { %1027 = vmatprep.subr.bf16.mxu1 %v1462_v21  ;;  %v1500_v0 = vld [vmem:[%s1844_s2 + $0x140] ss:$8 sps:$4 sm:$0xff]   ;;  %s1762_s29 = scalar_lea.vmem %s1843_s1, %s1401_s22  ;;  %v485_v5 = vor.u32 %v483_v62, %v473_v51  ;;  %v1511_v7 = vld [vmem:[%s1707_s20 + $0x34] ss:$8 sps:$4 sm:$0xff]   ;;  %v475_v9 = vshrl.u32 %v1507_v48, 16  ;;  %v499_v12 = vshrl.u32 %v1508_v52, 16 }
  0x21   : > { %v474_v61 = vsel %vm450_vm1, %v469_v55, %v473_v51  ;;  %v1501_v1 = vld [vmem:[%s1844_s2 + $0x80] ss:$8 sps:$4 sm:$0xff]   ;;  %v457_v2 = vor.u32 %v456_v58, %v452_v57  ;;  %v461_v3 = vrot.slane %v459_v59, 1  ;;  %v489_v6 = vrot.slane %v487_v63, 1  ;;  %v1513_v16 = vld [vmem:[%s1707_s20 + $0x30] ss:$8 sps:$4 sm:$0xff]  }
  0x22   : > { %771 = vmatpush1.bf16.msra.mxu0 %v1464_v22  ;;  %1356 = vmatprep.mubr.msk.bf16.mxu0 %vm732_vm0, %v474_v61  ;;  %v1510_v4 = vld [vmem:[%s1707_s20 + $0x20] ss:$8 sps:$4 sm:$0xff]   ;;  %v503_v13 = vshll.u32 %v1511_v7, 16  ;;  %v1514_v19 = vld [vmem:[%s1707_s20 + $0x44] ss:$8 sps:$4 sm:$0xff]   ;;  %v495_v22 = vshll.u32 %v1513_v16, 16 }
  0x23   : > { %1028 = vmatpush1.bf16.msra.mxu1 %v1465_v23  ;;  %772 = vmatprep.subr.bf16.mxu0 %v1466_v24  ;;  %v462_v8 = vsel %vm450_vm1, %v457_v2, %v461_v3  ;;  %v479_v10 = vshll.u32 %v1510_v4, 16  ;;  %v490_v11 = vsel %vm450_vm1, %v485_v5, %v489_v6  ;;  %v477_v14 = vor.u32 %v475_v9, %v461_v3  ;;  %v1523_v55 = vld [vmem:[%s1707_s20 + $0x74] ss:$8 sps:$4 sm:$0xff]   ;;  %v1526_v3 = vld [vmem:[%s1762_s29 + $0x4] ss:$8 sps:$4 sm:$0xff]   ;;  %s1402_s30 = sshll.u32 %s1851_s12, 7 }
  0x24   : > { %1029 = vmatprep.subr.bf16.mxu1 %v1468_v25  ;;  %v501_v17 = vor.u32 %v499_v12, %v489_v6  ;;  %v505_v18 = vrot.slane %v503_v13, 1  ;;  %v491_v21 = vshrl.u32 %v1510_v4, 16  ;;  %v515_v24 = vshrl.u32 %v1511_v7, 16  ;;  %v1528_v12 = vld [vmem:[%s1762_s29] ss:$8 sps:$4 sm:$0xff]   ;;  %s1815_s5 = scalar_lea.vmem %s1845_s3, %s1402_s30 }
  0x25   : > { %v481_v15 = vrot.slane %v479_v10, 1  ;;  %v519_v25 = vshll.u32 %v1514_v19, 16  ;;  %v567_v61 = vshll.u32 %v1523_v55, 16  ;;  %v583_v9 = vshll.u32 %v1526_v3, 16 }
  0x26   : > { %773 = vmatpush1.bf16.msra.mxu0 %v1470_v26  ;;  %v506_v23 = vsel %vm450_vm1, %v501_v17, %v505_v18 }
  0x27   : > { %1030 = vmatpush1.bf16.msra.mxu1 %v1471_v27  ;;  %774 = vmatprep.subr.bf16.mxu0 %v1472_v28  ;;  %v482_v20 = vsel %vm450_vm1, %v477_v14, %v481_v15  ;;  %v493_v26 = vor.u32 %v491_v21, %v481_v15  ;;  %v497_v27 = vrot.slane %v495_v22, 1  ;;  %v1516_v28 = vld [vmem:[%s1707_s20 + $0x40] ss:$8 sps:$4 sm:$0xff]   ;;  %v569_v2 = vrot.slane %v567_v61, 1  ;;  %v1529_v15 = vld [vmem:[%s1762_s29 + $0x14] ss:$8 sps:$4 sm:$0xff]  }
  0x28   : > { %1031 = vmatprep.subr.bf16.mxu1 %v1474_v29  ;;  %v517_v29 = vor.u32 %v515_v24, %v505_v18  ;;  %v523_v45 = vshrl.u32 %v1516_v28, 16  ;;  %v585_v14 = vrot.slane %v583_v9, 1  ;;  %v575_v18 = vshll.u32 %v1528_v12, 16  ;;  %v1531_v24 = vld [vmem:[%s1762_s29 + $0x10] ss:$8 sps:$4 sm:$0xff]  }
  0x29   : > { %v599_v21 = vshll.u32 %v1529_v15, 16 }
  0x2a   : > { %775 = vmatpush1.bf16.msra.mxu0 %v1476_v30  ;;  %v521_v30 = vrot.slane %v519_v25, 1 }
  0x2b   : > { %1032 = vmatpush1.bf16.msra.mxu1 %v1477_v31  ;;  %784 = vmatprep.subr.bf16.mxu0 %v1478_v32  ;;  %v1517_v31 = vld [vmem:[%s1707_s20 + $0x54] ss:$8 sps:$4 sm:$0xff]   ;;  %v498_v32 = vsel %vm450_vm1, %v493_v26, %v497_v27  ;;  %v601_v26 = vrot.slane %v599_v21, 1 }
  0x2c   : > { %1041 = vmatprep.subr.bf16.mxu1 %v1480_v33  ;;  %v507_v33 = vshrl.u32 %v1513_v16, 16 }
  0x2e   : > { %785 = vmatpush2.bf16.msra.mxu0 %v1482_v34  ;;  %v511_v34 = vshll.u32 %v1516_v28, 16  ;;  %v509_v38 = vor.u32 %v507_v33, %v497_v27 }
  0x2f   : > { %1042 = vmatpush2.bf16.msra.mxu1 %v1483_v35  ;;  %786 = vmatprep.subr.bf16.mxu0 %v1484_v36  ;;  %v522_v35 = vsel %vm450_vm1, %v517_v29, %v521_v30  ;;  %v531_v36 = vshrl.u32 %v1514_v19, 16  ;;  %v591_v29 = vshll.u32 %v1531_v24, 16 }
  0x30   : > { %1043 = vmatprep.subr.bf16.mxu1 %v1486_v37  ;;  %v535_v37 = vshll.u32 %v1517_v31, 16 }
  0x32   : > { %787 = vmatpush2.bf16.msra.mxu0 %v1488_v40  ;;  %v1519_v40 = vld [vmem:[%s1707_s20 + $0x50] ss:$8 sps:$4 sm:$0xff]  }
  0x33   : > { %1044 = vmatpush2.bf16.msra.mxu1 %v1489_v41  ;;  %788 = vmatprep.subr.bf16.mxu0 %v1490_v43  ;;  %v533_v41 = vor.u32 %v531_v36, %v521_v30  ;;  %v1520_v43 = vld [vmem:[%s1707_s20 + $0x64] ss:$8 sps:$4 sm:$0xff]   ;;  %v527_v46 = vshll.u32 %v1519_v40, 16  ;;  %v539_v57 = vshrl.u32 %v1519_v40, 16 }
  0x34   : > { %1045 = vmatprep.subr.bf16.mxu1 %v1492_v47  ;;  %v551_v49 = vshll.u32 %v1520_v43, 16 }
  0x35   : > { %v529_v51 = vrot.slane %v527_v46, 1 }
  0x36   : > { %789 = vmatpush2.bf16.msra.mxu0 %v1494_v53 }
  0x37   : > { %1046 = vmatpush2.bf16.msra.mxu1 %v1495_v54  ;;  %790 = vmatprep.subr.bf16.mxu0 %v1496_v56  ;;  %v553_v54 = vrot.slane %v551_v49, 1  ;;  %v541_v62 = vor.u32 %v539_v57, %v529_v51 }
  0x38   : > { %1047 = vmatprep.subr.bf16.mxu1 %v1498_v60  ;;  %v563_v60 = vshrl.u32 %v1520_v43, 16 }
  0x3a   : > { %791 = vmatpush2.bf16.msra.mxu0 %v1500_v0  ;;  %v1525_v0 = vld [vmem:[%s1707_s20 + $0x70] ss:$8 sps:$4 sm:$0xff]  }
  0x3b   : > { %1048 = vmatpush2.bf16.msra.mxu1 %v1501_v1  ;;  %v565_v1 = vor.u32 %v563_v60, %v553_v54  ;;  %v559_v6 = vshll.u32 %v1525_v0, 16  ;;  %v571_v17 = vshrl.u32 %v1525_v0, 16 }
  0x3d   : > { %793 = vmatmul.mubr.bf16.vlgmr.msra.gmra.mxu0 %v462_v8  ;;  %v579_v8 = vshrl.u32 %v1523_v55, 16 }
  0x3e   : > { %1050 = vmatmul.mubr.bf16.vlgmr.msra.gmra.mxu1 %v1506_v42  ;;  %1357 = vmatprep.mubr.msk.bf16.mxu0 %vm732_vm0, %v490_v11  ;;  %v537_v42 = vrot.slane %v535_v37, 1  ;;  %v561_v11 = vrot.slane %v559_v6, 1 }
  0x3f   : > { %1390 = vmatprep.mubr.msk.bf16.mxu1 %vm732_vm0, %v1504_v39  ;;  %v513_v39 = vrot.slane %v511_v34, 1  ;;  %v581_v13 = vor.u32 %v579_v8, %v569_v2 }
  0x40   : > { %v538_v47 = vsel %vm450_vm1, %v533_v41, %v537_v42  ;;  %v573_v22 = vor.u32 %v571_v17, %v561_v11 }
  0x41   : > { %v514_v44 = vsel %vm450_vm1, %v509_v38, %v513_v39  ;;  %v525_v50 = vor.u32 %v523_v45, %v513_v39 }
  0x43   : > { %v530_v56 = vsel %vm450_vm1, %v525_v50, %v529_v51 }
  0x45   : > { %801 = vmatmul.mubr.bf16.gmra.mxu0 %v482_v20  ;;  %v595_v20 = vshrl.u32 %v1526_v3, 16 }
  0x46   : > { %1058 = vmatmul.mubr.bf16.gmra.mxu1 %v1507_v48  ;;  %1358 = vmatprep.mubr.msk.bf16.mxu0 %vm732_vm0, %v506_v23  ;;  %v547_v48 = vshrl.u32 %v1517_v31, 16  ;;  %v577_v23 = vrot.slane %v575_v18, 1 }
  0x47   : > { %1391 = vmatprep.mubr.msk.bf16.mxu1 %vm732_vm0, %v1508_v52  ;;  %v1522_v52 = vld [vmem:[%s1707_s20 + $0x60] ss:$8 sps:$4 sm:$0xff]   ;;  %v597_v25 = vor.u32 %v595_v20, %v585_v14 }
  0x48   : > { %v549_v53 = vor.u32 %v547_v48, %v537_v42  ;;  %v543_v58 = vshll.u32 %v1522_v52, 16  ;;  %v555_v5 = vshrl.u32 %v1522_v52, 16  ;;  %v578_v27 = vsel %vm450_vm1, %v573_v22, %v577_v23 }
  0x49   : > { %v602_v30 = vsel %vm450_vm1, %v597_v25, %v601_v26 }
  0x4a   : > { %v554_v59 = vsel %vm450_vm1, %v549_v53, %v553_v54  ;;  %v545_v63 = vrot.slane %v543_v58, 1 }
  0x4c   : > { %v557_v10 = vor.u32 %v555_v5, %v545_v63 }
  0x4d   : > { %811 = vmatmul.mubr.bf16.gmra.mxu0 %v498_v32  ;;  %v593_v32 = vrot.slane %v591_v29, 1 }
  0x4e   : > { %1068 = vmatmul.mubr.bf16.gmra.mxu1 %v1510_v4  ;;  %1359 = vmatprep.mubr.msk.bf16.mxu0 %vm732_vm0, %v522_v35  ;;  %v546_v4 = vsel %vm450_vm1, %v541_v62, %v545_v63 }
  0x4f   : > { %1392 = vmatprep.mubr.msk.bf16.mxu1 %vm732_vm0, %v1511_v7  ;;  %v570_v7 = vsel %vm450_vm1, %v565_v1, %v569_v2 }
  0x55   : > { %821 = vmatmul.mubr.bf16.gmra.mxu0 %v514_v44 }
  0x56   : > { %1078 = vmatmul.mubr.bf16.gmra.mxu1 %v1513_v16  ;;  %1360 = vmatprep.mubr.msk.bf16.mxu0 %vm732_vm0, %v538_v47  ;;  %v562_v16 = vsel %vm450_vm1, %v557_v10, %v561_v11 }
  0x57   : > { %1393 = vmatprep.mubr.msk.bf16.mxu1 %vm732_vm0, %v1514_v19  ;;  %v586_v19 = vsel %vm450_vm1, %v581_v13, %v585_v14 }
  0x5d   : > { %831 = vmatmul.mubr.bf16.gmra.mxu0 %v530_v56 }
  0x5e   : > { %1088 = vmatmul.mubr.bf16.gmra.mxu1 %v1516_v28  ;;  %1361 = vmatprep.mubr.msk.bf16.mxu0 %vm732_vm0, %v554_v59  ;;  %v587_v28 = vshrl.u32 %v1528_v12, 16 }
  0x5f   : > { %1394 = vmatprep.mubr.msk.bf16.mxu1 %vm732_vm0, %v1517_v31 }
  0x60   : > { %v589_v31 = vor.u32 %v587_v28, %v577_v23 }
  0x62   : > { %v594_v33 = vsel %vm450_vm1, %v589_v31, %v593_v32 }
  0x65   : > { %841 = vmatmul.mubr.bf16.gmra.mxu0 %v546_v4 }
  0x66   : > { %1098 = vmatmul.mubr.bf16.gmra.mxu1 %v1519_v40  ;;  %1362 = vmatprep.mubr.msk.bf16.mxu0 %vm732_vm0, %v570_v7 }
  0x67   : > { %1395 = vmatprep.mubr.msk.bf16.mxu1 %vm732_vm0, %v1520_v43 }
  0x6d   : > { %851 = vmatmul.mubr.bf16.gmra.mxu0 %v562_v16 }
  0x6e   : > { %1108 = vmatmul.mubr.bf16.gmra.mxu1 %v1522_v52  ;;  %1363 = vmatprep.mubr.msk.bf16.mxu0 %vm732_vm0, %v586_v19 }
  0x6f   : > { %1396 = vmatprep.mubr.msk.bf16.mxu1 %vm732_vm0, %v1523_v55 }
  0x75   : > { %861 = vmatmul.mubr.bf16.gmra.mxu0 %v578_v27 }
  0x76   : > { %1118 = vmatmul.mubr.bf16.gmra.mxu1 %v1525_v0  ;;  %1364 = vmatprep.mubr.msk.bf16.mxu0 %vm732_vm0, %v602_v30 }
  0x77   : > { %1397 = vmatprep.mubr.msk.bf16.mxu1 %vm732_vm0, %v1526_v3 }
  0x7d   : > { %871 = vmatmul.mubr.bf16.gmra.mxu0 %v594_v33 }
  0x7e   : > { %1128 = vmatmul.mubr.bf16.gmra.mxu1 %v1528_v12 }
  0xfd   : > { %v794_v34 = vpop.f32.mrf.mxu0 }
  0xfe   : > { %v1051_v35 = vpop.f32.mrf.mxu1 }
  0xff   : > { %v796_v36 = vpop.f32.mrf.mxu0  ;;  %v1052_v46 = vadd.f32 %v1051_v35, %v794_v34 }
 0x100   : > { %v1053_v37 = vpop.f32.mrf.mxu1 }
 0x101   : > { %v797_v38 = vpop.f32.mrf.mxu0 }
 0x102   : > { %v1054_v39 = vpop.f32.mrf.mxu1 }
 0x103   : > { %v799_v40 = vpop.f32.mrf.mxu0  ;;  %v1055_v53 = vadd.f32 %v1054_v39, %v797_v38 }
 0x104   : > { %v1056_v41 = vpop.f32.mrf.mxu1 }
 0x105   : > { %v802_v42 = vpop.f32.mrf.mxu0 }
 0x106   : > { %v1059_v43 = vpop.f32.mrf.mxu1 }
 0x107   : > { %v804_v44 = vpop.f32.mrf.mxu0  ;;  %v1060_v60 = vadd.f32 %v1059_v43, %v802_v42 }
 0x108   : > { %v1061_v45 = vpop.f32.mrf.mxu1 }
 0x109   : > { %v1062_v47 = vadd.f32 %v1061_v45, %v804_v44  ;;  %v806_v48 = vpop.f32.mrf.mxu0 }
 0x10a   : > { %v1063_v49 = vpop.f32.mrf.mxu1 }
 0x10b   : > { %v1136_v50 = vadd.f32 %v1062_v47, %v1052_v46  ;;  %v808_v51 = vpop.f32.mrf.mxu0  ;;  %v1064_v3 = vadd.f32 %v1063_v49, %v806_v48 }
 0x10c   : > { %v1065_v52 = vpop.f32.mrf.mxu1 }
 0x10d   : > { %1152 = vst [vmem:[%s1815_s5] sm:$0xff] %v1136_v50  ;;  %v1066_v54 = vadd.f32 %v1065_v52, %v808_v51  ;;  %v812_v55 = vpop.f32.mrf.mxu0 }
 0x10e   : > { %v1069_v56 = vpop.f32.mrf.mxu1 }
 0x10f   : > { %v1137_v57 = vadd.f32 %v1066_v54, %v1055_v53  ;;  %v814_v58 = vpop.f32.mrf.mxu0  ;;  %v1070_v10 = vadd.f32 %v1069_v56, %v812_v55 }
 0x110   : > { %v1071_v59 = vpop.f32.mrf.mxu1 }
 0x111   : > { %1153 = vst [vmem:[%s1815_s5 + $0x8] sm:$0xff] %v1137_v57  ;;  %v1072_v61 = vadd.f32 %v1071_v59, %v814_v58  ;;  %v816_v62 = vpop.f32.mrf.mxu0 }
 0x112   : > { %v1073_v63 = vpop.f32.mrf.mxu1 }
 0x113   : > { %v1138_v0 = vadd.f32 %v1072_v61, %v1060_v60  ;;  %v818_v1 = vpop.f32.mrf.mxu0  ;;  %v1074_v17 = vadd.f32 %v1073_v63, %v816_v62 }
 0x114   : > { %v1075_v2 = vpop.f32.mrf.mxu1 }
 0x115   : > { %1154 = vst [vmem:[%s1815_s5 + $0x10] sm:$0xff] %v1138_v0  ;;  %v1076_v4 = vadd.f32 %v1075_v2, %v818_v1  ;;  %v822_v5 = vpop.f32.mrf.mxu0 }
 0x116   : > { %v1079_v6 = vpop.f32.mrf.mxu1 }
 0x117   : > { %v1139_v7 = vadd.f32 %v1076_v4, %v1064_v3  ;;  %v824_v8 = vpop.f32.mrf.mxu0  ;;  %v1080_v24 = vadd.f32 %v1079_v6, %v822_v5 }
 0x118   : > { %v1081_v9 = vpop.f32.mrf.mxu1 }
 0x119   : > { %1155 = vst [vmem:[%s1815_s5 + $0x18] sm:$0xff] %v1139_v7  ;;  %v1082_v11 = vadd.f32 %v1081_v9, %v824_v8  ;;  %v826_v12 = vpop.f32.mrf.mxu0 }
 0x11a   : > { %v1083_v13 = vpop.f32.mrf.mxu1 }
 0x11b   : > { %v1140_v14 = vadd.f32 %v1082_v11, %v1070_v10  ;;  %v828_v15 = vpop.f32.mrf.mxu0  ;;  %v1084_v31 = vadd.f32 %v1083_v13, %v826_v12 }
 0x11c   : > { %v1085_v16 = vpop.f32.mrf.mxu1 }
 0x11d   : > { %1156 = vst [vmem:[%s1815_s5 + $0x20] sm:$0xff] %v1140_v14  ;;  %v1086_v18 = vadd.f32 %v1085_v16, %v828_v15  ;;  %v832_v19 = vpop.f32.mrf.mxu0 }
 0x11e   : > { %v1089_v20 = vpop.f32.mrf.mxu1 }
 0x11f   : > { %v1141_v21 = vadd.f32 %v1086_v18, %v1074_v17  ;;  %v834_v22 = vpop.f32.mrf.mxu0  ;;  %v1090_v38 = vadd.f32 %v1089_v20, %v832_v19 }
 0x120   : > { %v1091_v23 = vpop.f32.mrf.mxu1 }
 0x121   : > { %1157 = vst [vmem:[%s1815_s5 + $0x28] sm:$0xff] %v1141_v21  ;;  %v1092_v25 = vadd.f32 %v1091_v23, %v834_v22  ;;  %v836_v26 = vpop.f32.mrf.mxu0 }
 0x122   : > { %v1093_v27 = vpop.f32.mrf.mxu1 }
 0x123   : > { %v1142_v28 = vadd.f32 %v1092_v25, %v1080_v24  ;;  %v838_v29 = vpop.f32.mrf.mxu0  ;;  %v1094_v45 = vadd.f32 %v1093_v27, %v836_v26 }
 0x124   : > { %v1095_v30 = vpop.f32.mrf.mxu1 }
 0x125   : > { %1158 = vst [vmem:[%s1815_s5 + $0x30] sm:$0xff] %v1142_v28  ;;  %v1096_v32 = vadd.f32 %v1095_v30, %v838_v29  ;;  %v842_v33 = vpop.f32.mrf.mxu0 }
 0x126   : > { %v1099_v34 = vpop.f32.mrf.mxu1 }
 0x127   : > { %v1143_v35 = vadd.f32 %v1096_v32, %v1084_v31  ;;  %v844_v36 = vpop.f32.mrf.mxu0  ;;  %v1100_v52 = vadd.f32 %v1099_v34, %v842_v33 }
 0x128   : > { %v1101_v37 = vpop.f32.mrf.mxu1 }
 0x129   : > { %1159 = vst [vmem:[%s1815_s5 + $0x38] sm:$0xff] %v1143_v35  ;;  %v1102_v39 = vadd.f32 %v1101_v37, %v844_v36  ;;  %v846_v40 = vpop.f32.mrf.mxu0 }
 0x12a   : > { %v1103_v41 = vpop.f32.mrf.mxu1 }
 0x12b   : > { %v1144_v42 = vadd.f32 %v1102_v39, %v1090_v38  ;;  %v848_v43 = vpop.f32.mrf.mxu0  ;;  %v1104_v59 = vadd.f32 %v1103_v41, %v846_v40 }
 0x12c   : > { %v1105_v44 = vpop.f32.mrf.mxu1 }
 0x12d   : > { %1160 = vst [vmem:[%s1815_s5 + $0x40] sm:$0xff] %v1144_v42  ;;  %v1106_v46 = vadd.f32 %v1105_v44, %v848_v43  ;;  %v852_v47 = vpop.f32.mrf.mxu0 }
 0x12e   : > { %v1109_v48 = vpop.f32.mrf.mxu1 }
 0x12f   : > { %v1145_v49 = vadd.f32 %v1106_v46, %v1094_v45  ;;  %v854_v50 = vpop.f32.mrf.mxu0  ;;  %v1110_v2 = vadd.f32 %v1109_v48, %v852_v47 }
 0x130   : > { %v1111_v51 = vpop.f32.mrf.mxu1 }
 0x131   : > { %1161 = vst [vmem:[%s1815_s5 + $0x48] sm:$0xff] %v1145_v49  ;;  %v1112_v53 = vadd.f32 %v1111_v51, %v854_v50  ;;  %v856_v54 = vpop.f32.mrf.mxu0 }
 0x132   : > { %v1113_v55 = vpop.f32.mrf.mxu1 }
 0x133   : > { %v1146_v56 = vadd.f32 %v1112_v53, %v1100_v52  ;;  %v858_v57 = vpop.f32.mrf.mxu0  ;;  %v1114_v9 = vadd.f32 %v1113_v55, %v856_v54 }
 0x134   : > { %v1115_v58 = vpop.f32.mrf.mxu1 }
 0x135   : > { %1162 = vst [vmem:[%s1815_s5 + $0x50] sm:$0xff] %v1146_v56  ;;  %v1116_v60 = vadd.f32 %v1115_v58, %v858_v57  ;;  %v862_v61 = vpop.f32.mrf.mxu0 }
 0x136   : > { %v1119_v62 = vpop.f32.mrf.mxu1 }
 0x137   : > { %v1147_v63 = vadd.f32 %v1116_v60, %v1104_v59  ;;  %v864_v0 = vpop.f32.mrf.mxu0  ;;  %v1120_v16 = vadd.f32 %v1119_v62, %v862_v61 }
 0x138   : > { %v1121_v1 = vpop.f32.mrf.mxu1 }
 0x139   : > { %1163 = vst [vmem:[%s1815_s5 + $0x58] sm:$0xff] %v1147_v63  ;;  %v1122_v3 = vadd.f32 %v1121_v1, %v864_v0  ;;  %v866_v4 = vpop.f32.mrf.mxu0 }
 0x13a   : > { %v1123_v5 = vpop.f32.mrf.mxu1 }
 0x13b   : > { %v1148_v6 = vadd.f32 %v1122_v3, %v1110_v2  ;;  %v868_v7 = vpop.f32.mrf.mxu0  ;;  %v1124_v23 = vadd.f32 %v1123_v5, %v866_v4 }
 0x13c   : > { %v1125_v8 = vpop.f32.mrf.mxu1 }
 0x13d   : > { %1164 = vst [vmem:[%s1815_s5 + $0x60] sm:$0xff] %v1148_v6  ;;  %v1126_v10 = vadd.f32 %v1125_v8, %v868_v7  ;;  %v872_v11 = vpop.f32.mrf.mxu0 }
 0x13e   : > { %v1129_v12 = vpop.f32.mrf.mxu1 }
 0x13f   : > { %v1149_v13 = vadd.f32 %v1126_v10, %v1114_v9  ;;  %v873_v14 = vpop.f32.mrf.mxu0 }
 0x140   : > { %v1130_v15 = vpop.f32.mrf.mxu1 }
 0x141   : > { %1165 = vst [vmem:[%s1815_s5 + $0x68] sm:$0xff] %v1149_v13  ;;  %v1131_v17 = vadd.f32 %v1130_v15, %v873_v14  ;;  %v875_v18 = vpop.f32.mrf.mxu0 }
 0x142   : > { %v1132_v19 = vpop.f32.mrf.mxu1 }
 0x143   : > { %v1150_v20 = vadd.f32 %v1131_v17, %v1120_v16  ;;  %v876_v21 = vpop.f32.mrf.mxu0 }
 0x144   : > { %v1133_v22 = vpop.f32.mrf.mxu1 }
 0x145   : > { %1166 = vst [vmem:[%s1815_s5 + $0x70] sm:$0xff] %v1150_v20  ;;  %v1134_v24 = vadd.f32 %v1133_v22, %v876_v21 }
 0x147   : > { %v1151_v25 = vadd.f32 %v1134_v24, %v1124_v23 }
 0x149   : > { %1167 = vst [vmem:[%s1815_s5 + $0x78] sm:$0xff] %v1151_v25 }
 0x14a PF: > { %s13_s14 = sadd.s32 1, %s1554_s14   ;;  %s1846_s12 = smov %s1550_s13 }
 0x14b   : > { %p10_p5 = scmp.ge.s32.totalorder %s13_s14, 4   ;;  %s1847_s13 = smov %s1849_s15 }
 0x14d   :  { %12 = sbr.rel (!%p10_p5) target bundleno = 2 (0x2), region = 66 }

</bundles_post_ra>
